<compile_context>
chip_gen: v7x
topology: tpu7x:2x2x1
jax: 0.10.0
libtpu: 0.0.40
codegen_flags: <defaults>
</compile_context>

<pallas_src>
import jax
import jax.numpy as jnp
from jax.experimental import pallas as pl
from jax.experimental.pallas import tpu as pltpu


def aux_classifier_kernel(x_ref, w_ref, b_ref, out_ref):
    # Single fused matmul: (TILE_N, C*H*W) @ (C*H*W, num_classes) + bias.
    logits = jnp.dot(x_ref[...], w_ref[...],
                     preferred_element_type=jnp.float32) + b_ref[...]
    # Row softmax (classes on the lane axis).
    m = jnp.max(logits, axis=1, keepdims=True)
    e = jnp.exp(logits - m)
    inv = pl.reciprocal(jnp.sum(e, axis=1, keepdims=True), approx=False)
    out_ref[...] = e * inv


def aux_classifier_forward(x, params, *, tile_n=128):
    """x: (N, C, H, W) float32; params match the PyTorch module's layers."""
    N, C, H, W = x.shape
    K, S = 5, 3
    OH = (H - K) // S + 1
    OW = (W - K) // S + 1
    # fc1.in_features == conv_out, so the pooled map must be 1x1 spatially.
    assert OH == 1 and OW == 1, "AuxClassifier requires a 1x1 pooled spatial map"

    conv_w, conv_b, fc1_w, fc1_b, fc2_w, fc2_b = params
    conv_out = conv_w.shape[0]
    num_classes = fc2_w.shape[0]
    f32 = jnp.float32

    # --- Offline affine fusion (exact: the spec module has no nonlinearity here) ---
    wc = conv_w.reshape(conv_out, C).T.astype(f32)      # (C, conv_out)
    w1 = fc1_w.T.astype(f32)                            # (conv_out, fc_out)
    w2 = fc2_w.T.astype(f32)                            # (fc_out, num_classes)
    w_chain = wc @ w1 @ w2                               # (C, num_classes)
    b_chain = (conv_b.astype(f32) @ w1 + fc1_b.astype(f32)) @ w2 + fc2_b.astype(f32)

    # Fold the 5x5/stride-3 average pool (1x1 output -> top-left window) into the weight:
    # W_full[(c,h,w), k] = (1/25 if h<5 and w<5 else 0) * w_chain[c, k].
    mask = jnp.zeros((H, W), f32).at[0:K, 0:K].set(1.0 / (K * K))
    w_full = (mask.reshape(1, H * W, 1) * w_chain[:, None, :]).reshape(C * H * W, num_classes)
    b_full = b_chain.reshape(1, num_classes)

    x2 = x.reshape(N, C * H * W).astype(f32)

    # --- Batch tiling: pad N to a multiple of tile_n, tile it on a parallel grid axis ---
    n_pad = (-N) % tile_n
    if n_pad:
        x2 = jnp.pad(x2, ((0, n_pad), (0, 0)))
    n_rows = x2.shape[0]
    n_tiles = n_rows // tile_n
    kdim = C * H * W

    out = pl.pallas_call(
        aux_classifier_kernel,
        out_shape=jax.ShapeDtypeStruct((n_rows, num_classes), f32),
        grid=(n_tiles,),
        in_specs=[
            pl.BlockSpec((tile_n, kdim), lambda i: (i, 0)),          # x tile
            pl.BlockSpec((kdim, num_classes), lambda i: (0, 0)),     # fused weight
            pl.BlockSpec((1, num_classes), lambda i: (0, 0)),        # fused bias
        ],
        out_specs=pl.BlockSpec((tile_n, num_classes), lambda i: (i, 0)),
        compiler_params=pltpu.CompilerParams(
            dimension_semantics=("parallel",)),
    )(x2, w_full, b_full)
    return out[:N]


if __name__ == "__main__":
    key = jax.random.PRNGKey(0)
    N, C, H, W = 256, 8, 7, 7                # in_features = 8, batch tiled as 2 x 128
    conv_out, fc_out, num_classes = 16, 32, 10
    ks = jax.random.split(key, 7)

    x = jax.random.normal(ks[0], (N, C, H, W), jnp.float32)
    conv_w = jax.random.normal(ks[1], (conv_out, C, 1, 1), jnp.float32) * 0.1
    conv_b = jax.random.normal(ks[2], (conv_out,), jnp.float32) * 0.1
    fc1_w = jax.random.normal(ks[3], (fc_out, conv_out), jnp.float32) * 0.1
    fc1_b = jax.random.normal(ks[4], (fc_out,), jnp.float32) * 0.1
    fc2_w = jax.random.normal(ks[5], (num_classes, fc_out), jnp.float32) * 0.1
    fc2_b = jax.random.normal(ks[6], (num_classes,), jnp.float32) * 0.1
    params = (conv_w, conv_b, fc1_w, fc1_b, fc2_w, fc2_b)

    out = aux_classifier_forward(x, params)
    out = jax.block_until_ready(out)

    # Pure-JAX reference (mirrors the PyTorch forward, layer by layer, unfused).
    pooled = jnp.mean(x[:, :, 0:5, 0:5], axis=(2, 3))                 # AvgPool2d(5,3) -> 1x1
    conv = pooled @ conv_w.reshape(conv_out, C).T + conv_b            # 1x1 conv, then flatten
    h1 = conv @ fc1_w.T + fc1_b
    h2 = h1 @ fc2_w.T + fc2_b
    ref = jax.nn.softmax(h2, axis=1)

    assert out.shape == (N, num_classes)
    assert jnp.allclose(out, ref, atol=1e-5, rtol=1e-5)

    print("KERNEL_OK")
</pallas_src>

<mosaic_0001>
module attributes {stable_mosaic.version = 11 : i64} {
  func.func @aux_classifier_kernel(%arg0: i32, %arg1: memref<128x392xf32, #tpu.memory_space<vmem>>, %arg2: memref<392x10xf32, #tpu.memory_space<vmem>>, %arg3: memref<1x10xf32, #tpu.memory_space<vmem>>, %arg4: memref<128x10xf32, #tpu.memory_space<vmem>>) attributes {dimension_semantics = [#tpu.dimension_semantics<parallel>], iteration_bounds = array<i64: 2>, scalar_prefetch = 0 : i64, scratch_operands = 0 : i64, tpu.core_type = #tpu.core_type<tc>, window_params = [{transform_indices = @transform_0, window_bounds = array<i64: 128, 392>}, {pipeline_mode = #tpu.pipeline_mode<synchronous>, transform_indices = @transform_1, window_bounds = array<i64: 392, 10>}, {pipeline_mode = #tpu.pipeline_mode<synchronous>, transform_indices = @transform_2, window_bounds = array<i64: 1, 10>}, {transform_indices = @transform_3, window_bounds = array<i64: 128, 10>}]} {
    %c0 = arith.constant 0 : index
    %c0_0 = arith.constant 0 : index
    %0 = vector.load %arg1[%c0, %c0_0] : memref<128x392xf32, #tpu.memory_space<vmem>>, vector<128x392xf32>
    %c0_1 = arith.constant 0 : index
    %c0_2 = arith.constant 0 : index
    %1 = vector.load %arg2[%c0_1, %c0_2] : memref<392x10xf32, #tpu.memory_space<vmem>>, vector<392x10xf32>
    %cst = arith.constant dense<0.000000e+00> : vector<128x10xf32>
    %2 = tpu.matmul %0, %1, %cst {dimension_numbers = #tpu.dot_dimension_numbers<[1], [0], [0], [1], [0, 0, 1, 1], [], []>} : vector<128x392xf32>, vector<392x10xf32>, vector<128x10xf32> -> vector<128x10xf32>
    %c0_3 = arith.constant 0 : index
    %c0_4 = arith.constant 0 : index
    %3 = vector.load %arg3[%c0_3, %c0_4] : memref<1x10xf32, #tpu.memory_space<vmem>>, vector<1x10xf32>
    %4 = vector.broadcast %3 : vector<1x10xf32> to vector<128x10xf32>
    %5 = arith.addf %2, %4 : vector<128x10xf32>
    %cst_5 = arith.constant dense<0xFF800000> : vector<128xf32>
    %6 = vector.multi_reduction <maximumf>, %5, %cst_5 [1] : vector<128x10xf32> to vector<128xf32>
    %7 = vector.shape_cast %6 : vector<128xf32> to vector<128x1xf32>
    %8 = vector.broadcast %7 : vector<128x1xf32> to vector<128x10xf32>
    %9 = arith.subf %5, %8 : vector<128x10xf32>
    %10 = math.exp %9 : vector<128x10xf32>
    %cst_6 = arith.constant dense<0.000000e+00> : vector<128xf32>
    %11 = vector.multi_reduction <add>, %10, %cst_6 [1] : vector<128x10xf32> to vector<128xf32>
    %12 = vector.shape_cast %11 : vector<128xf32> to vector<128x1xf32>
    %13 = tpu.reciprocal %12 : vector<128x1xf32> -> vector<128x1xf32>
    %14 = vector.broadcast %13 : vector<128x1xf32> to vector<128x10xf32>
    %15 = arith.mulf %10, %14 : vector<128x10xf32>
    %c0_7 = arith.constant 0 : index
    %c0_8 = arith.constant 0 : index
    %16 = vector.load %arg4[%c0_7, %c0_8] : memref<128x10xf32, #tpu.memory_space<vmem>>, vector<128x10xf32>
    tpu.vector_store %arg4[%c0_7, %c0_8], %15 {strides = array<i32>} : memref<128x10xf32, #tpu.memory_space<vmem>>, vector<128x10xf32>,
    return
  }
  func.func @transform_0(%arg0: i32) -> (i32, i32) {
    %c0_i32 = arith.constant 0 : i32
    %c0_i32_0 = arith.constant 0 : i32
    return %arg0, %c0_i32 : i32, i32
  }
  func.func @transform_1(%arg0: i32) -> (i32, i32) {
    %c0_i32 = arith.constant 0 : i32
    %c0_i32_0 = arith.constant 0 : i32
    %c0_i32_1 = arith.constant 0 : i32
    return %c0_i32, %c0_i32_0 : i32, i32
  }
  func.func @transform_2(%arg0: i32) -> (i32, i32) {
    %c0_i32 = arith.constant 0 : i32
    %c0_i32_0 = arith.constant 0 : i32
    %c0_i32_1 = arith.constant 0 : i32
    return %c0_i32, %c0_i32_0 : i32, i32
  }
  func.func @transform_3(%arg0: i32) -> (i32, i32) {
    %c0_i32 = arith.constant 0 : i32
    %c0_i32_0 = arith.constant 0 : i32
    return %arg0, %c0_i32 : i32, i32
  }
}

</mosaic_0001>

<bundles_post_ra>
// kernel: tpu_custom_call.1
= control target key start
LH: loop header
LB: loop body
LE: loop exit
PB: predicated region body
PF: predicated region fallthrough
CT: control target
= control target key end

     0   :  { %s1155_s12 = smov 0   ;;  %s1634_s0 = inlined_call_operand.vmem [shape: f32[256,392], index: 0, kind: input, shape index: {}]   ;;  %s1635_s1 = inlined_call_operand.vmem [shape: f32[392,10], index: 1, kind: input, shape index: {}]   ;;  %s1636_s2 = inlined_call_operand.vmem [shape: f32[1,10], index: 2, kind: input, shape index: {}]   ;;  %s1637_s3 = inlined_call_operand.vmem [shape: f32[256,10], index: 3, kind: output, shape index: {}]  }
   0x1 LB: > { %s885_s13 = sadd.s32 4294967295, %s1131_s12   ;;  %p889_p0 = scmp.ge.s32.totalorder %s1131_s12, 1  ;;  %s1131_s12 = sphi %s1155_s12, %s13_s12  }
   0x2   : > { %p139_p1 = scmp.lt.s32.totalorder %s1131_s12, 3 }
   0x4   : > { %p140_p2 = pnand %p889_p0, %p139_p1 }
   0x5   : > { %v257_v0 = vld [vmem:[%s1635_s1 + $0x80] sm:$0xff] (!%p140_p2)  ;;  %v258_v1 = vld [vmem:[%s1635_s1 + $0x88] sm:$0xff] (!%p140_p2)  ;;  %s1172_s20 = sshll.u32 (!%p140_p2), %s885_s13, 4  ;;  %v1133_v5 = vmov (!%p140_p2), 0.0|0.0   ;;  %v259_v10 = vld [vmem:[%s1635_s1 + $0x90] sm:$0xff] (!%p140_p2)  ;;  %vm297_vm0 = vcmask (!%p140_p2), 64512  }
   0x6   : > { %143 = sbr.rel (%p140_p2) target bundleno = 634 (0x27a), region = 32  ;;  %v241_v2 = vld [vmem:[%s1635_s1] sm:$0xff] (!%p140_p2)  ;;  %v995_v3 = vpack.c.bf16 (!%p140_p2), %v258_v1, %v257_v0  ;;  %v242_v4 = vld [vmem:[%s1635_s1 + $0x8] sm:$0xff] (!%p140_p2)  ;;  %1027 = vmatprep.subr.bf16.mxu1 (!%p140_p2), %v1133_v5  ;;  %p165_p3 = scmp.lt.s32.totalorder (!%p140_p2), %s1172_s20, 31  ;;  %v260_v11 = vld [vmem:[%s1635_s1 + $0x98] sm:$0xff] (!%p140_p2)  ;;  %vm636_vm1 = vcmask (!%p140_p2), 80896  }
   0x7   : > { %v273_v6 = vld [vmem:[%s1635_s1 + $0x100] sm:$0xff] (!%p140_p2)  ;;  %v274_v7 = vld [vmem:[%s1635_s1 + $0x108] sm:$0xff] (!%p140_p2)  ;;  %v997_v8 = vpack.c.bf16 (!%p140_p2), %v242_v4, %v241_v2  ;;  %v243_v12 = vld [vmem:[%s1635_s1 + $0x10] sm:$0xff] (!%p140_p2)  ;;  %v999_v13 = vpack.c.bf16 (!%p140_p2), %v260_v11, %v259_v10 }
   0x8   : > { %v1028_v9 = vpack.c.bf16 (!%p140_p2), %v274_v7, %v273_v6  ;;  %996 = vmatprep.subr.bf16.mxu0 (!%p140_p2), %v995_v3  ;;  %v244_v14 = vld [vmem:[%s1635_s1 + $0x18] sm:$0xff] (!%p140_p2)  ;;  %v275_v15 = vld [vmem:[%s1635_s1 + $0x110] sm:$0xff] (!%p140_p2)  ;;  %v261_v19 = vld [vmem:[%s1635_s1 + $0xa0] sm:$0xff] (!%p140_p2) }
   0x9   : > { %v276_v16 = vld [vmem:[%s1635_s1 + $0x118] sm:$0xff] (!%p140_p2)  ;;  %998 = vmatpush3.bf16.msra.mxu0 (!%p140_p2), %v997_v8  ;;  %v1001_v17 = vpack.c.bf16 (!%p140_p2), %v244_v14, %v243_v12  ;;  %v262_v20 = vld [vmem:[%s1635_s1 + $0xa8] sm:$0xff] (!%p140_p2)  ;;  %v245_v21 = vld [vmem:[%s1635_s1 + $0x20] sm:$0xff] (!%p140_p2) }
   0xa   : > { %1029 = vmatpush1.bf16.msra.mxu1 (!%p140_p2), %v1028_v9  ;;  %v1031_v18 = vpack.c.bf16 (!%p140_p2), %v276_v16, %v275_v15  ;;  %1000 = vmatprep.subr.bf16.mxu0 (!%p140_p2), %v999_v13  ;;  %v1003_v22 = vpack.c.bf16 (!%p140_p2), %v262_v20, %v261_v19  ;;  %v246_v23 = vld [vmem:[%s1635_s1 + $0x28] sm:$0xff] (!%p140_p2)  ;;  %v277_v24 = vld [vmem:[%s1635_s1 + $0x120] sm:$0xff] (!%p140_p2)  ;;  %v263_v26 = vld [vmem:[%s1635_s1 + $0xb0] sm:$0xff] (!%p140_p2)  ;;  %v1134_v13 = vmov (!%p140_p2), 0.0  }
   0xb   : > { %1030 = vmatprep.subr.bf16.mxu1 (!%p140_p2), %v1133_v5  ;;  %v278_v25 = vld [vmem:[%s1635_s1 + $0x128] sm:$0xff] (!%p140_p2)  ;;  %v264_v27 = vld [vmem:[%s1635_s1 + $0xb8] sm:$0xff] (!%p140_p2)  ;;  %v1005_v28 = vpack.c.bf16 (!%p140_p2), %v246_v23, %v245_v21  ;;  %v247_v30 = vld [vmem:[%s1635_s1 + $0x30] sm:$0xff] (!%p140_p2) }
   0xc   : > { %v1034_v29 = vpack.c.bf16 (!%p140_p2), %v278_v25, %v277_v24  ;;  %v1007_v31 = vpack.c.bf16 (!%p140_p2), %v264_v27, %v263_v26  ;;  %v248_v32 = vld [vmem:[%s1635_s1 + $0x38] sm:$0xff] (!%p140_p2)  ;;  %v279_v33 = vld [vmem:[%s1635_s1 + $0x130] sm:$0xff] (!%p140_p2)  ;;  %v265_v35 = vld [vmem:[%s1635_s1 + $0xc0] sm:$0xff] (!%p140_p2) }
   0xd   : > { %s1639_s20 = smov (!%p165_p3, %s1172_s20), 31  ;;  %1002 = vmatpush3.bf16.msra.mxu0 %v1001_v17  ;;  %v280_v34 = vld [vmem:[%s1635_s1 + $0x138] sm:$0xff]  ;;  %v266_v36 = vld [vmem:[%s1635_s1 + $0xc8] sm:$0xff]  ;;  %v1009_v37 = vpack.c.bf16 %v248_v32, %v247_v30  ;;  %v249_v39 = vld [vmem:[%s1635_s1 + $0x40] sm:$0xff] }
   0xe   : > { %1032 = vmatpush1.bf16.msra.mxu1 %v1031_v18  ;;  %1004 = vmatprep.subr.bf16.mxu0 %v1003_v22  ;;  %s914_s11 = sshll.u32 %s1639_s20, 5  ;;  %v1037_v38 = vpack.c.bf16 %v280_v34, %v279_v33  ;;  %v1011_v40 = vpack.c.bf16 %v266_v36, %v265_v35  ;;  %v250_v41 = vld [vmem:[%s1635_s1 + $0x48] sm:$0xff]  ;;  %v281_v42 = vld [vmem:[%s1635_s1 + $0x140] sm:$0xff]  ;;  %v267_v44 = vld [vmem:[%s1635_s1 + $0xd0] sm:$0xff] }
   0xf   : > { %1033 = vmatprep.subr.bf16.mxu1 %v1133_v5  ;;  %s1259_s22 = scalar_lea.vmem %s1634_s0, %s914_s11  ;;  %v282_v43 = vld [vmem:[%s1635_s1 + $0x148] sm:$0xff]  ;;  %v268_v45 = vld [vmem:[%s1635_s1 + $0xd8] sm:$0xff]  ;;  %v1013_v47 = vpack.c.bf16 %v250_v41, %v249_v39  ;;  %v251_v49 = vld [vmem:[%s1635_s1 + $0x50] sm:$0xff] }
  0x10   : > { %v178_v46 = vld [vmem:[%s1259_s22 + $0x8] sm:$0xff]  ;;  %v1040_v48 = vpack.c.bf16 %v282_v43, %v281_v42  ;;  %v252_v50 = vld [vmem:[%s1635_s1 + $0x58] sm:$0xff]  ;;  %v1015_v51 = vpack.c.bf16 %v268_v45, %v267_v44  ;;  %v283_v52 = vld [vmem:[%s1635_s1 + $0x150] sm:$0xff] }
  0x11   : > { %1006 = vmatpush3.bf16.msra.mxu0 %v1005_v28  ;;  %v284_v53 = vld [vmem:[%s1635_s1 + $0x158] sm:$0xff]  ;;  %v269_v55 = vld [vmem:[%s1635_s1 + $0xe0] sm:$0xff]  ;;  %v270_v56 = vld [vmem:[%s1635_s1 + $0xe8] sm:$0xff]  ;;  %410 = vmatprep.mubr.f32.mxu0 %v178_v46  ;;  %v1017_v57 = vpack.c.bf16 %v252_v50, %v251_v49 }
  0x12   : > { %1035 = vmatpush1.bf16.msra.mxu1 %v1034_v29  ;;  %1008 = vmatprep.subr.bf16.mxu0 %v1007_v31  ;;  %v180_v54 = vld [vmem:[%s1259_s22 + $0x18] sm:$0xff]  ;;  %v1043_v58 = vpack.c.bf16 %v284_v53, %v283_v52  ;;  %v253_v59 = vld [vmem:[%s1635_s1 + $0x60] sm:$0xff]  ;;  %v1019_v60 = vpack.c.bf16 %v270_v56, %v269_v55  ;;  %v254_v61 = vld [vmem:[%s1635_s1 + $0x68] sm:$0xff] }
  0x13   : > { %1036 = vmatprep.subr.bf16.mxu1 %v1133_v5  ;;  %896 = vmatprep.mubr.msk.f32.mxu1 %vm297_vm0, %v180_v54  ;;  %v285_v62 = vld [vmem:[%s1635_s1 + $0x160] sm:$0xff]  ;;  %v286_v63 = vld [vmem:[%s1635_s1 + $0x168] sm:$0xff]  ;;  %v271_v0 = vld [vmem:[%s1635_s1 + $0xf0] sm:$0xff]  ;;  %v1021_v2 = vpack.c.bf16 %v254_v61, %v253_v59 }
  0x14   : > { %v272_v1 = vld [vmem:[%s1635_s1 + $0xf8] sm:$0xff]  ;;  %v1046_v3 = vpack.c.bf16 %v286_v63, %v285_v62  ;;  %v255_v4 = vld [vmem:[%s1635_s1 + $0x70] sm:$0xff]  ;;  %v177_v12 = vld [vmem:[%s1259_s22] sm:$0xff] }
  0x15   : > { %1010 = vmatpush3.bf16.msra.mxu0 %v1009_v37  ;;  %v1023_v6 = vpack.c.bf16 %v272_v1, %v271_v0  ;;  %v256_v7 = vld [vmem:[%s1635_s1 + $0x78] sm:$0xff]  ;;  %v287_v8 = vld [vmem:[%s1635_s1 + $0x170] sm:$0xff]  ;;  %v182_v14 = vld [vmem:[%s1259_s22 + $0x28] sm:$0xff] }
  0x16   : > { %1038 = vmatpush1.bf16.msra.mxu1 %v1037_v38  ;;  %1012 = vmatprep.subr.bf16.mxu0 %v1011_v40  ;;  %v288_v9 = vld [vmem:[%s1635_s1 + $0x178] sm:$0xff]  ;;  %v1025_v10 = vpack.c.bf16 %v256_v7, %v255_v4  ;;  %v289_v15 = vld [vmem:[%s1635_s1 + $0x180] sm:$0xff]  ;;  %v179_v16 = vld [vmem:[%s1259_s22 + $0x10] sm:$0xff] }
  0x17   : > { %1039 = vmatprep.subr.bf16.mxu1 %v1133_v5  ;;  %v1049_v11 = vpack.c.bf16 %v288_v9, %v287_v8  ;;  %v184_v17 = vld [vmem:[%s1259_s22 + $0x38] sm:$0xff]  ;;  %v186_v18 = vld [vmem:[%s1259_s22 + $0x48] sm:$0xff]  ;;  %v183_v19 = vld [vmem:[%s1259_s22 + $0x30] sm:$0xff] }
  0x18   : > { %v188_v20 = vld [vmem:[%s1259_s22 + $0x58] sm:$0xff]  ;;  %v185_v21 = vld [vmem:[%s1259_s22 + $0x40] sm:$0xff]  ;;  %v190_v22 = vld [vmem:[%s1259_s22 + $0x68] sm:$0xff] }
  0x19   : > { %1014 = vmatpush3.bf16.msra.mxu0 %v1013_v47  ;;  %v187_v23 = vld [vmem:[%s1259_s22 + $0x50] sm:$0xff]  ;;  %v192_v24 = vld [vmem:[%s1259_s22 + $0x78] sm:$0xff]  ;;  %v189_v25 = vld [vmem:[%s1259_s22 + $0x60] sm:$0xff] }
  0x1a   : > { %1041 = vmatpush1.bf16.msra.mxu1 %v1040_v48  ;;  %1016 = vmatprep.subr.bf16.mxu0 %v1015_v51  ;;  %v194_v26 = vld [vmem:[%s1259_s22 + $0x88] sm:$0xff]  ;;  %v191_v27 = vld [vmem:[%s1259_s22 + $0x70] sm:$0xff]  ;;  %v196_v28 = vld [vmem:[%s1259_s22 + $0x98] sm:$0xff] }
  0x1b   : > { %1042 = vmatprep.subr.bf16.mxu1 %v1133_v5  ;;  %v193_v29 = vld [vmem:[%s1259_s22 + $0x80] sm:$0xff]  ;;  %v198_v30 = vld [vmem:[%s1259_s22 + $0xa8] sm:$0xff]  ;;  %v195_v31 = vld [vmem:[%s1259_s22 + $0x90] sm:$0xff] }
  0x1c   : > { %v200_v32 = vld [vmem:[%s1259_s22 + $0xb8] sm:$0xff]  ;;  %v197_v33 = vld [vmem:[%s1259_s22 + $0xa0] sm:$0xff]  ;;  %v202_v34 = vld [vmem:[%s1259_s22 + $0xc8] sm:$0xff] }
  0x1d   : > { %1018 = vmatpush3.bf16.msra.mxu0 %v1017_v57  ;;  %v199_v35 = vld [vmem:[%s1259_s22 + $0xb0] sm:$0xff]  ;;  %v204_v36 = vld [vmem:[%s1259_s22 + $0xd8] sm:$0xff]  ;;  %v201_v37 = vld [vmem:[%s1259_s22 + $0xc0] sm:$0xff] }
  0x1e   : > { %1044 = vmatpush1.bf16.msra.mxu1 %v1043_v58  ;;  %1020 = vmatprep.subr.bf16.mxu0 %v1019_v60  ;;  %v206_v38 = vld [vmem:[%s1259_s22 + $0xe8] sm:$0xff]  ;;  %v203_v39 = vld [vmem:[%s1259_s22 + $0xd0] sm:$0xff]  ;;  %v208_v40 = vld [vmem:[%s1259_s22 + $0xf8] sm:$0xff] }
  0x1f   : > { %1045 = vmatprep.subr.bf16.mxu1 %v1133_v5  ;;  %v205_v41 = vld [vmem:[%s1259_s22 + $0xe0] sm:$0xff]  ;;  %v210_v42 = vld [vmem:[%s1259_s22 + $0x108] sm:$0xff]  ;;  %v207_v43 = vld [vmem:[%s1259_s22 + $0xf0] sm:$0xff] }
  0x20   : > { %v212_v44 = vld [vmem:[%s1259_s22 + $0x118] sm:$0xff]  ;;  %v209_v45 = vld [vmem:[%s1259_s22 + $0x100] sm:$0xff]  ;;  %v214_v46 = vld [vmem:[%s1259_s22 + $0x128] sm:$0xff] }
  0x21   : > { %1022 = vmatpush3.bf16.msra.mxu0 %v1021_v2  ;;  %v211_v47 = vld [vmem:[%s1259_s22 + $0x110] sm:$0xff]  ;;  %v216_v48 = vld [vmem:[%s1259_s22 + $0x138] sm:$0xff]  ;;  %v213_v49 = vld [vmem:[%s1259_s22 + $0x120] sm:$0xff] }
  0x22   : > { %1047 = vmatpush1.bf16.msra.mxu1 %v1046_v3  ;;  %1024 = vmatprep.subr.bf16.mxu0 %v1023_v6  ;;  %v218_v50 = vld [vmem:[%s1259_s22 + $0x148] sm:$0xff]  ;;  %v215_v51 = vld [vmem:[%s1259_s22 + $0x130] sm:$0xff]  ;;  %v220_v52 = vld [vmem:[%s1259_s22 + $0x158] sm:$0xff] }
  0x23   : > { %1048 = vmatprep.subr.bf16.mxu1 %v1133_v5  ;;  %v181_v5 = vld [vmem:[%s1259_s22 + $0x20] sm:$0xff]  ;;  %v222_v54 = vld [vmem:[%s1259_s22 + $0x168] sm:$0xff]  ;;  %v219_v55 = vld [vmem:[%s1259_s22 + $0x150] sm:$0xff] }
  0x24   : > { %v217_v53 = vld [vmem:[%s1259_s22 + $0x140] sm:$0xff]  ;;  %v224_v56 = vld [vmem:[%s1259_s22 + $0x178] sm:$0xff]  ;;  %v226_v58 = vld [vmem:[%s1259_s22 + $0x188] sm:$0xff] }
  0x25   : > { %1026 = vmatpush3.bf16.msra.mxu0 %v1025_v10  ;;  %v221_v57 = vld [vmem:[%s1259_s22 + $0x160] sm:$0xff]  ;;  %v223_v59 = vld [vmem:[%s1259_s22 + $0x170] sm:$0xff]  ;;  %v228_v60 = vld [vmem:[%s1259_s22 + $0x198] sm:$0xff] }
  0x26   : > { %1050 = vmatpush1.bf16.msra.mxu1 %v1049_v11  ;;  %v225_v61 = vld [vmem:[%s1259_s22 + $0x180] sm:$0xff]  ;;  %v230_v62 = vld [vmem:[%s1259_s22 + $0x1a8] sm:$0xff]  ;;  %v227_v63 = vld [vmem:[%s1259_s22 + $0x190] sm:$0xff] }
  0x27   : > { %523 = vmatprep.subr.mxu1 %v1134_v13  ;;  %v232_v0 = vld [vmem:[%s1259_s22 + $0x1b8] sm:$0xff]  ;;  %v229_v1 = vld [vmem:[%s1259_s22 + $0x1a0] sm:$0xff]  ;;  %v234_v2 = vld [vmem:[%s1259_s22 + $0x1c8] sm:$0xff] }
  0x28   : > { %411 = vmatmul.mubr.f32.vlgmr.msra.gmra.mrb[0].mxu0 %v177_v12  ;;  %v231_v3 = vld [vmem:[%s1259_s22 + $0x1b0] sm:$0xff]  ;;  %v236_v4 = vld [vmem:[%s1259_s22 + $0x1d8] sm:$0xff]  ;;  %v233_v6 = vld [vmem:[%s1259_s22 + $0x1c0] sm:$0xff] }
  0x29   : > { %415 = vmatprep.mubr.f32.mxu0 %v182_v14  ;;  %v238_v7 = vld [vmem:[%s1259_s22 + $0x1e8] sm:$0xff]  ;;  %v235_v8 = vld [vmem:[%s1259_s22 + $0x1d0] sm:$0xff]  ;;  %v240_v9 = vld [vmem:[%s1259_s22 + $0x1f8] sm:$0xff] }
  0x2a   : > { %524 = vmatpush1.msra.mxu1 %v289_v15  ;;  %v237_v10 = vld [vmem:[%s1259_s22 + $0x1e0] sm:$0xff]  ;;  %v239_v11 = vld [vmem:[%s1259_s22 + $0x1f0] sm:$0xff]  ;;  %s894_s22 = sshll.u32 %s1639_s20, 3 }
  0x2b   : > { %556 = vmatmul.mubr.f32.vlgmr.msra.gmra.mrb[0].mxu1 %v179_v16  ;;  %v1415_v14 = vld [vmem:[%s1636_s2] ss:$0 sm:$0xff]  ;;  %s1581_s23 = scalar_lea.vmem %s1637_s3, %s894_s22 }
  0x2c   : > { %897 = vmatprep.mubr.msk.f32.mxu1 %vm297_vm0, %v184_v17  ;;  %416 = vmatmul.mubr.f32.gmra.mrb[2].mxu0 %v181_v5 }
  0x2d   : > { %420 = vmatprep.mubr.f32.mxu0 %v186_v18 }
  0x2f   : > { %561 = vmatmul.mubr.f32.gmra.mrb[2].mxu1 %v183_v19 }
  0x30   : > { %898 = vmatprep.mubr.msk.f32.mxu1 %vm297_vm0, %v188_v20  ;;  %421 = vmatmul.mubr.f32.gmra.mrb[4].mxu0 %v185_v21 }
  0x31   : > { %425 = vmatprep.mubr.f32.mxu0 %v190_v22 }
  0x33   : > { %566 = vmatmul.mubr.f32.gmra.mrb[4].mxu1 %v187_v23 }
  0x34   : > { %899 = vmatprep.mubr.msk.f32.mxu1 %vm297_vm0, %v192_v24  ;;  %426 = vmatmul.mubr.f32.gmra.mrb[6].mxu0 %v189_v25 }
  0x35   : > { %430 = vmatprep.mubr.f32.mxu0 %v194_v26 }
  0x37   : > { %571 = vmatmul.mubr.f32.gmra.mrb[6].mxu1 %v191_v27 }
  0x38   : > { %900 = vmatprep.mubr.msk.f32.mxu1 %vm297_vm0, %v196_v28  ;;  %431 = vmatmul.mubr.f32.gmra.mrb[8].mxu0 %v193_v29 }
  0x39   : > { %435 = vmatprep.mubr.f32.mxu0 %v198_v30 }
  0x3b   : > { %576 = vmatmul.mubr.f32.gmra.mrb[8].mxu1 %v195_v31 }
  0x3c   : > { %901 = vmatprep.mubr.msk.f32.mxu1 %vm297_vm0, %v200_v32  ;;  %436 = vmatmul.mubr.f32.gmra.mrb[10].mxu0 %v197_v33 }
  0x3d   : > { %440 = vmatprep.mubr.f32.mxu0 %v202_v34 }
  0x3f   : > { %581 = vmatmul.mubr.f32.gmra.mrb[10].mxu1 %v199_v35 }
  0x40   : > { %902 = vmatprep.mubr.msk.f32.mxu1 %vm297_vm0, %v204_v36  ;;  %441 = vmatmul.mubr.f32.gmra.mrb[12].mxu0 %v201_v37 }
  0x41   : > { %445 = vmatprep.mubr.f32.mxu0 %v206_v38 }
  0x43   : > { %586 = vmatmul.mubr.f32.gmra.mrb[12].mxu1 %v203_v39 }
  0x44   : > { %903 = vmatprep.mubr.msk.f32.mxu1 %vm297_vm0, %v208_v40  ;;  %446 = vmatmul.mubr.f32.gmra.mrb[14].mxu0 %v205_v41 }
  0x45   : > { %450 = vmatprep.mubr.f32.mxu0 %v210_v42 }
  0x47   : > { %591 = vmatmul.mubr.f32.gmra.mrb[14].mxu1 %v207_v43 }
  0x48   : > { %904 = vmatprep.mubr.msk.f32.mxu1 %vm297_vm0, %v212_v44  ;;  %451 = vmatmul.mubr.f32.gmra.mrb[16].mxu0 %v209_v45 }
  0x49   : > { %455 = vmatprep.mubr.f32.mxu0 %v214_v46 }
  0x4b   : > { %596 = vmatmul.mubr.f32.gmra.mrb[16].mxu1 %v211_v47 }
  0x4c   : > { %905 = vmatprep.mubr.msk.f32.mxu1 %vm297_vm0, %v216_v48  ;;  %456 = vmatmul.mubr.f32.gmra.mrb[18].mxu0 %v213_v49 }
  0x4d   : > { %460 = vmatprep.mubr.f32.mxu0 %v218_v50 }
  0x4f   : > { %601 = vmatmul.mubr.f32.gmra.mrb[18].mxu1 %v215_v51 }
  0x50   : > { %906 = vmatprep.mubr.msk.f32.mxu1 %vm297_vm0, %v220_v52  ;;  %461 = vmatmul.mubr.f32.gmra.mrb[20].mxu0 %v217_v53 }
  0x51   : > { %465 = vmatprep.mubr.f32.mxu0 %v222_v54 }
  0x53   : > { %606 = vmatmul.mubr.f32.gmra.mrb[20].mxu1 %v219_v55 }
  0x54   : > { %907 = vmatprep.mubr.msk.f32.mxu1 %vm297_vm0, %v224_v56  ;;  %466 = vmatmul.mubr.f32.gmra.mrb[22].mxu0 %v221_v57 }
  0x55   : > { %470 = vmatprep.mubr.f32.mxu0 %v226_v58 }
  0x57   : > { %611 = vmatmul.mubr.f32.gmra.mrb[22].mxu1 %v223_v59 }
  0x58   : > { %908 = vmatprep.mubr.msk.f32.mxu1 %vm297_vm0, %v228_v60  ;;  %471 = vmatmul.mubr.f32.gmra.mrb[24].mxu0 %v225_v61 }
  0x59   : > { %475 = vmatprep.mubr.f32.mxu0 %v230_v62 }
  0x5b   : > { %616 = vmatmul.mubr.f32.gmra.mrb[24].mxu1 %v227_v63 }
  0x5c   : > { %909 = vmatprep.mubr.msk.f32.mxu1 %vm297_vm0, %v232_v0  ;;  %476 = vmatmul.mubr.f32.gmra.mrb[26].mxu0 %v229_v1 }
  0x5d   : > { %480 = vmatprep.mubr.f32.mxu0 %v234_v2 }
  0x5f   : > { %621 = vmatmul.mubr.f32.gmra.mrb[26].mxu1 %v231_v3 }
  0x60   : > { %910 = vmatprep.mubr.msk.f32.mxu1 %vm297_vm0, %v236_v4  ;;  %481 = vmatmul.mubr.f32.gmra.mrb[28].mxu0 %v233_v6 }
  0x61   : > { %485 = vmatprep.mubr.f32.mxu0 %v238_v7 }
  0x63   : > { %626 = vmatmul.mubr.f32.gmra.mrb[28].mxu1 %v235_v8 }
  0x64   : > { %911 = vmatprep.mubr.msk.f32.mxu1 %vm297_vm0, %v240_v9  ;;  %486 = vmatmul.mubr.f32.gmra.mrb[30].mxu0 %v237_v10 }
  0x67   : > { %631 = vmatmul.mubr.f32.gmra.mrb[30].mxu1 %v239_v11 }
  0xfb   : > { %v947_v12 = vpop.f32.mrb[0].mxu0 }
  0xfc   : > { %v948_v13 = vpop.f32.mrb[1].mxu0 }
  0xfd   : > { %v949_v15 = vadd.f32 %v948_v13, %v947_v12 }
  0xfe   : > { %v557_v16 = vpop.f32.mrb[0].mxu1 }
  0xff   : > { %v559_v17 = vpop.f32.mrb[1].mxu1  ;;  %v950_v5 = vpop.f32.mrb[2].mxu0  ;;  %v413_v18 = vadd.f32 %v949_v15, %v1415_v14 }
 0x100   : > { %v951_v19 = vpop.f32.mrb[3].mxu0 }
 0x101   : > { %v1418_v20 = vadd.f32 %v557_v16, %v413_v18  ;;  %v952_v21 = vadd.f32 %v951_v19, %v950_v5 }
 0x102   : > { %v562_v22 = vpop.f32.mrb[2].mxu1 }
 0x103   : > { %v564_v23 = vpop.f32.mrb[3].mxu1  ;;  %v953_v24 = vpop.f32.mrb[4].mxu0  ;;  %v418_v25 = vadd.f32 %v952_v21, %v1415_v14  ;;  %v637_v26 = vsel %vm636_vm1, %v1418_v20, -inf }
 0x104   : > { %v954_v27 = vpop.f32.mrb[5].mxu0  ;;  %638 = vmax.xlane.f32.xlu0 %v637_v26 }
 0x105   : > { %v1423_v28 = vadd.f32 %v562_v22, %v418_v25  ;;  %v955_v29 = vadd.f32 %v954_v27, %v953_v24 }
 0x106   : > { %v567_v30 = vpop.f32.mrb[4].mxu1 }
 0x107   : > { %v569_v31 = vpop.f32.mrb[5].mxu1  ;;  %v956_v32 = vpop.f32.mrb[6].mxu0  ;;  %v423_v33 = vadd.f32 %v955_v29, %v1415_v14  ;;  %v640_v34 = vsel %vm636_vm1, %v1423_v28, -inf }
 0x108   : > { %v957_v35 = vpop.f32.mrb[7].mxu0  ;;  %641 = vmax.xlane.f32.xlu0 %v640_v34 }
 0x109   : > { %v1428_v36 = vadd.f32 %v567_v30, %v423_v33  ;;  %v958_v37 = vadd.f32 %v957_v35, %v956_v32 }
 0x10a   : > { %v572_v38 = vpop.f32.mrb[6].mxu1 }
 0x10b   : > { %v574_v39 = vpop.f32.mrb[7].mxu1  ;;  %v959_v40 = vpop.f32.mrb[8].mxu0  ;;  %v428_v41 = vadd.f32 %v958_v37, %v1415_v14  ;;  %v643_v42 = vsel %vm636_vm1, %v1428_v36, -inf }
 0x10c   : > { %v960_v43 = vpop.f32.mrb[9].mxu0  ;;  %644 = vmax.xlane.f32.xlu1 %v643_v42 }
 0x10d   : > { %v1433_v44 = vadd.f32 %v572_v38, %v428_v41  ;;  %v961_v45 = vadd.f32 %v960_v43, %v959_v40 }
 0x10e   : > { %v577_v46 = vpop.f32.mrb[8].mxu1 }
 0x10f   : > { %v579_v47 = vpop.f32.mrb[9].mxu1  ;;  %v962_v48 = vpop.f32.mrb[10].mxu0  ;;  %v433_v49 = vadd.f32 %v961_v45, %v1415_v14  ;;  %v646_v50 = vsel %vm636_vm1, %v1433_v44, -inf }
 0x110   : > { %v963_v51 = vpop.f32.mrb[11].mxu0  ;;  %647 = vmax.xlane.f32.xlu1 %v646_v50 }
 0x111   : > { %v1438_v52 = vadd.f32 %v577_v46, %v433_v49  ;;  %v964_v53 = vadd.f32 %v963_v51, %v962_v48 }
 0x112   : > { %v582_v54 = vpop.f32.mrb[10].mxu1 }
 0x113   : > { %v584_v55 = vpop.f32.mrb[11].mxu1  ;;  %v965_v56 = vpop.f32.mrb[12].mxu0  ;;  %v438_v57 = vadd.f32 %v964_v53, %v1415_v14  ;;  %v649_v58 = vsel %vm636_vm1, %v1438_v52, -inf }
 0x114   : > { %v966_v59 = vpop.f32.mrb[13].mxu0  ;;  %650 = vmax.xlane.f32.xlu0 %v649_v58 }
 0x115   : > { %v1443_v60 = vadd.f32 %v582_v54, %v438_v57  ;;  %v967_v61 = vadd.f32 %v966_v59, %v965_v56 }
 0x116   : > { %v587_v62 = vpop.f32.mrb[12].mxu1 }
 0x117   : > { %v589_v63 = vpop.f32.mrb[13].mxu1  ;;  %v968_v0 = vpop.f32.mrb[14].mxu0  ;;  %v443_v1 = vadd.f32 %v967_v61, %v1415_v14  ;;  %v652_v2 = vsel %vm636_vm1, %v1443_v60, -inf }
 0x118   : > { %v969_v3 = vpop.f32.mrb[15].mxu0  ;;  %653 = vmax.xlane.f32.xlu1 %v652_v2 }
 0x119   : > { %v1448_v4 = vadd.f32 %v587_v62, %v443_v1  ;;  %v970_v6 = vadd.f32 %v969_v3, %v968_v0 }
 0x11a   : > { %v592_v7 = vpop.f32.mrb[14].mxu1 }
 0x11b   : > { %v594_v8 = vpop.f32.mrb[15].mxu1  ;;  %v971_v9 = vpop.f32.mrb[16].mxu0  ;;  %v448_v10 = vadd.f32 %v970_v6, %v1415_v14  ;;  %v655_v11 = vsel %vm636_vm1, %v1448_v4, -inf }
 0x11c   : > { %v972_v12 = vpop.f32.mrb[17].mxu0  ;;  %656 = vmax.xlane.f32.xlu0 %v655_v11 }
 0x11d   : > { %v1453_v13 = vadd.f32 %v592_v7, %v448_v10  ;;  %v973_v15 = vadd.f32 %v972_v12, %v971_v9 }
 0x11e   : > { %v597_v16 = vpop.f32.mrb[16].mxu1 }
 0x11f   : > { %v599_v17 = vpop.f32.mrb[17].mxu1  ;;  %v974_v5 = vpop.f32.mrb[18].mxu0  ;;  %v453_v18 = vadd.f32 %v973_v15, %v1415_v14  ;;  %v658_v19 = vsel %vm636_vm1, %v1453_v13, -inf }
 0x120   : > { %v975_v21 = vpop.f32.mrb[19].mxu0  ;;  %659 = vmax.xlane.f32.xlu1 %v658_v19 }
 0x121   : > { %v1458_v22 = vadd.f32 %v597_v16, %v453_v18  ;;  %v976_v23 = vadd.f32 %v975_v21, %v974_v5 }
 0x122   : > { %v602_v24 = vpop.f32.mrb[18].mxu1 }
 0x123   : > { %v604_v25 = vpop.f32.mrb[19].mxu1  ;;  %v977_v26 = vpop.f32.mrb[20].mxu0  ;;  %v458_v27 = vadd.f32 %v976_v23, %v1415_v14  ;;  %v661_v29 = vsel %vm636_vm1, %v1458_v22, -inf }
 0x124   : > { %v978_v30 = vpop.f32.mrb[21].mxu0  ;;  %662 = vmax.xlane.f32.xlu0 %v661_v29 }
 0x125   : > { %v1463_v31 = vadd.f32 %v602_v24, %v458_v27  ;;  %v979_v32 = vadd.f32 %v978_v30, %v977_v26 }
 0x126   : > { %v607_v33 = vpop.f32.mrb[20].mxu1 }
 0x127   : > { %v609_v34 = vpop.f32.mrb[21].mxu1  ;;  %v980_v35 = vpop.f32.mrb[22].mxu0  ;;  %v463_v37 = vadd.f32 %v979_v32, %v1415_v14  ;;  %v664_v38 = vsel %vm636_vm1, %v1463_v31, -inf }
 0x128   : > { %v981_v39 = vpop.f32.mrb[23].mxu0  ;;  %665 = vmax.xlane.f32.xlu1 %v664_v38 }
 0x129   : > { %v1468_v40 = vadd.f32 %v607_v33, %v463_v37  ;;  %v982_v41 = vadd.f32 %v981_v39, %v980_v35 }
 0x12a   : > { %v612_v42 = vpop.f32.mrb[22].mxu1 }
 0x12b   : > { %v614_v43 = vpop.f32.mrb[23].mxu1  ;;  %v983_v45 = vpop.f32.mrb[24].mxu0  ;;  %v468_v46 = vadd.f32 %v982_v41, %v1415_v14  ;;  %v667_v47 = vsel %vm636_vm1, %v1468_v40, -inf }
 0x12c   : > { %v984_v48 = vpop.f32.mrb[25].mxu0  ;;  %668 = vmax.xlane.f32.xlu0 %v667_v47 }
 0x12d   : > { %v1473_v49 = vadd.f32 %v612_v42, %v468_v46  ;;  %v985_v50 = vadd.f32 %v984_v48, %v983_v45 }
 0x12e   : > { %v617_v51 = vpop.f32.mrb[24].mxu1 }
 0x12f   : > { %v619_v53 = vpop.f32.mrb[25].mxu1  ;;  %v986_v54 = vpop.f32.mrb[26].mxu0  ;;  %v473_v55 = vadd.f32 %v985_v50, %v1415_v14  ;;  %v670_v56 = vsel %vm636_vm1, %v1473_v49, -inf }
 0x130   : > { %v987_v57 = vpop.f32.mrb[27].mxu0  ;;  %671 = vmax.xlane.f32.xlu1 %v670_v56 }
 0x131   : > { %v1478_v58 = vadd.f32 %v617_v51, %v473_v55  ;;  %v988_v59 = vadd.f32 %v987_v57, %v986_v54 }
 0x132   : > { %v622_v61 = vpop.f32.mrb[26].mxu1 }
 0x133   : > { %v624_v62 = vpop.f32.mrb[27].mxu1  ;;  %v989_v63 = vpop.f32.mrb[28].mxu0  ;;  %v478_v0 = vadd.f32 %v988_v59, %v1415_v14  ;;  %v673_v1 = vsel %vm636_vm1, %v1478_v58, -inf }
 0x134   : > { %v990_v2 = vpop.f32.mrb[29].mxu0  ;;  %674 = vmax.xlane.f32.xlu0 %v673_v1 }
 0x135   : > { %v1483_v3 = vadd.f32 %v622_v61, %v478_v0  ;;  %v991_v6 = vadd.f32 %v990_v2, %v989_v63 }
 0x136   : > { %v627_v7 = vpop.f32.mrb[28].mxu1 }
 0x137   : > { %v629_v8 = vpop.f32.mrb[29].mxu1  ;;  %v992_v9 = vpop.f32.mrb[30].mxu0  ;;  %v483_v10 = vadd.f32 %v991_v6, %v1415_v14  ;;  %v676_v11 = vsel %vm636_vm1, %v1483_v3, -inf }
 0x138   : > { %v993_v12 = vpop.f32.mrb[31].mxu0  ;;  %677 = vmax.xlane.f32.xlu1 %v676_v11 }
 0x139   : > { %v1488_v15 = vadd.f32 %v627_v7, %v483_v10  ;;  %v994_v16 = vadd.f32 %v993_v12, %v992_v9 }
 0x13a   : > { %v632_v17 = vpop.f32.mrb[30].mxu1 }
 0x13b   : > { %v634_v5 = vpop.f32.mrb[31].mxu1  ;;  %v488_v18 = vadd.f32 %v994_v16, %v1415_v14  ;;  %v679_v19 = vsel %vm636_vm1, %v1488_v15, -inf }
 0x13c   : > { %680 = vmax.xlane.f32.xlu0 %v679_v19 }
 0x13d   : > { %v1493_v21 = vadd.f32 %v632_v17, %v488_v18 }
 0x13f   : > { %v682_v23 = vsel %vm636_vm1, %v1493_v21, -inf }
 0x140   : > { %683 = vmax.xlane.f32.xlu1 %v682_v23 }
 0x191   : > { %v639_v24 = vpop.xlane.xlu0 %638 }
 0x192   : > { %v685_v25 = vsub.f32 %v1418_v20, %v639_v24 }
 0x194   : > { %v701_v26 = vmul.f32 1.442695, %v685_v25 }
 0x195   : > { %v642_v27 = vpop.xlane.xlu0 %641 }
 0x196   : > { %1061 = vpow2.f32 %v701_v26  ;;  %v686_v29 = vsub.f32 %v1423_v28, %v642_v27 }
 0x198   : > { %v703_v30 = vmul.f32 1.442695, %v686_v29 }
 0x199   : > { %v645_v14 = vpop.xlane.xlu1 %644 }
 0x19a   : > { %1063 = vpow2.f32 %v703_v30  ;;  %v687_v32 = vsub.f32 %v1428_v36, %v645_v14 }
 0x19c   : > { %v705_v33 = vmul.f32 1.442695, %v687_v32 }
 0x19d   : > { %v648_v34 = vpop.xlane.xlu1 %647 }
 0x19e   : > { %1065 = vpow2.f32 %v705_v33  ;;  %v688_v35 = vsub.f32 %v1433_v44, %v648_v34 }
 0x1a0   : > { %v1501_v37 = vpop.eup %1061  ;;  %v707_v38 = vmul.f32 1.442695, %v688_v35 }
 0x1a1   : > { %v651_v39 = vpop.xlane.xlu0 %650  ;;  %v733_v20 = vsel %vm636_vm1, %v1501_v37, 0.0 }
 0x1a2   : > { %1067 = vpow2.f32 %v707_v38  ;;  %v689_v28 = vsub.f32 %v1438_v52, %v651_v39  ;;  %734 = vadd.xlane.f32.xlu0 %v733_v20 }
 0x1a4   : > { %v1506_v41 = vpop.eup %1063  ;;  %v709_v42 = vmul.f32 1.442695, %v689_v28 }
 0x1a5   : > { %v654_v36 = vpop.xlane.xlu1 %653  ;;  %v736_v43 = vsel %vm636_vm1, %v1506_v41, 0.0 }
 0x1a6   : > { %1069 = vpow2.f32 %v709_v42  ;;  %v690_v44 = vsub.f32 %v1443_v60, %v654_v36  ;;  %737 = vadd.xlane.f32.xlu1 %v736_v43 }
 0x1a8   : > { %v1511_v45 = vpop.eup %1065  ;;  %v711_v46 = vmul.f32 1.442695, %v690_v44 }
 0x1a9   : > { %v657_v47 = vpop.xlane.xlu0 %656  ;;  %v739_v48 = vsel %vm636_vm1, %v1511_v45, 0.0 }
 0x1aa   : > { %1071 = vpow2.f32 %v711_v46  ;;  %v691_v52 = vsub.f32 %v1448_v4, %v657_v47  ;;  %740 = vadd.xlane.f32.xlu0 %v739_v48 }
 0x1ac   : > { %v1516_v50 = vpop.eup %1067  ;;  %v713_v51 = vmul.f32 1.442695, %v691_v52 }
 0x1ad   : > { %v660_v53 = vpop.xlane.xlu1 %659  ;;  %v742_v54 = vsel %vm636_vm1, %v1516_v50, 0.0 }
 0x1ae   : > { %1073 = vpow2.f32 %v713_v51  ;;  %v692_v60 = vsub.f32 %v1453_v13, %v660_v53  ;;  %743 = vadd.xlane.f32.xlu1 %v742_v54 }
 0x1b0   : > { %v1521_v55 = vpop.eup %1069  ;;  %v715_v56 = vmul.f32 1.442695, %v692_v60 }
 0x1b1   : > { %v663_v57 = vpop.xlane.xlu0 %662  ;;  %v745_v59 = vsel %vm636_vm1, %v1521_v55, 0.0 }
 0x1b2   : > { %1075 = vpow2.f32 %v715_v56  ;;  %v693_v4 = vsub.f32 %v1458_v22, %v663_v57  ;;  %746 = vadd.xlane.f32.xlu0 %v745_v59 }
 0x1b4   : > { %v1526_v61 = vpop.eup %1071  ;;  %v717_v62 = vmul.f32 1.442695, %v693_v4 }
 0x1b5   : > { %v666_v63 = vpop.xlane.xlu1 %665  ;;  %v748_v0 = vsel %vm636_vm1, %v1526_v61, 0.0 }
 0x1b6   : > { %1077 = vpow2.f32 %v717_v62  ;;  %v694_v13 = vsub.f32 %v1463_v31, %v666_v63  ;;  %749 = vadd.xlane.f32.xlu1 %v748_v0 }
 0x1b8   : > { %v1531_v1 = vpop.eup %1073  ;;  %v719_v2 = vmul.f32 1.442695, %v694_v13 }
 0x1b9   : > { %v669_v6 = vpop.xlane.xlu0 %668  ;;  %v751_v7 = vsel %vm636_vm1, %v1531_v1, 0.0 }
 0x1ba   : > { %1079 = vpow2.f32 %v719_v2  ;;  %v695_v22 = vsub.f32 %v1468_v40, %v669_v6  ;;  %752 = vadd.xlane.f32.xlu0 %v751_v7 }
 0x1bc   : > { %v1536_v8 = vpop.eup %1075  ;;  %v721_v9 = vmul.f32 1.442695, %v695_v22 }
 0x1bd   : > { %v672_v10 = vpop.xlane.xlu1 %671  ;;  %v754_v11 = vsel %vm636_vm1, %v1536_v8, 0.0 }
 0x1be   : > { %1081 = vpow2.f32 %v721_v9  ;;  %v696_v31 = vsub.f32 %v1473_v49, %v672_v10  ;;  %755 = vadd.xlane.f32.xlu1 %v754_v11 }
 0x1c0   : > { %v1541_v12 = vpop.eup %1077  ;;  %v723_v16 = vmul.f32 1.442695, %v696_v31 }
 0x1c1   : > { %v675_v17 = vpop.xlane.xlu0 %674  ;;  %v757_v5 = vsel %vm636_vm1, %v1541_v12, 0.0 }
 0x1c2   : > { %1083 = vpow2.f32 %v723_v16  ;;  %v697_v40 = vsub.f32 %v1478_v58, %v675_v17  ;;  %758 = vadd.xlane.f32.xlu0 %v757_v5 }
 0x1c4   : > { %v1546_v18 = vpop.eup %1079  ;;  %v725_v19 = vmul.f32 1.442695, %v697_v40 }
 0x1c5   : > { %v678_v23 = vpop.xlane.xlu1 %677  ;;  %v760_v24 = vsel %vm636_vm1, %v1546_v18, 0.0 }
 0x1c6   : > { %1085 = vpow2.f32 %v725_v19  ;;  %v698_v49 = vsub.f32 %v1483_v3, %v678_v23  ;;  %761 = vadd.xlane.f32.xlu1 %v760_v24 }
 0x1c8   : > { %v1551_v25 = vpop.eup %1081  ;;  %v727_v26 = vmul.f32 1.442695, %v698_v49 }
 0x1c9   : > { %v681_v27 = vpop.xlane.xlu0 %680  ;;  %v763_v29 = vsel %vm636_vm1, %v1551_v25, 0.0 }
 0x1ca   : > { %1087 = vpow2.f32 %v727_v26  ;;  %v699_v58 = vsub.f32 %v1488_v15, %v681_v27  ;;  %764 = vadd.xlane.f32.xlu0 %v763_v29 }
 0x1cc   : > { %v1556_v30 = vpop.eup %1083  ;;  %v729_v14 = vmul.f32 1.442695, %v699_v58 }
 0x1cd   : > { %v684_v32 = vpop.xlane.xlu1 %683  ;;  %v766_v33 = vsel %vm636_vm1, %v1556_v30, 0.0 }
 0x1ce   : > { %1089 = vpow2.f32 %v729_v14  ;;  %v700_v3 = vsub.f32 %v1493_v21, %v684_v32  ;;  %767 = vadd.xlane.f32.xlu1 %v766_v33 }
 0x1d0   : > { %v1561_v34 = vpop.eup %1085  ;;  %v731_v35 = vmul.f32 1.442695, %v700_v3 }
 0x1d1   : > { %v769_v38 = vsel %vm636_vm1, %v1561_v34, 0.0 }
 0x1d2   : > { %1091 = vpow2.f32 %v731_v35  ;;  %770 = vadd.xlane.f32.xlu0 %v769_v38 }
 0x1d4   : > { %v1565_v15 = vpop.eup %1087 }
 0x1d5   : > { %v772_v39 = vsel %vm636_vm1, %v1565_v15, 0.0 }
 0x1d6   : > { %773 = vadd.xlane.f32.xlu1 %v772_v39 }
 0x1d8   : > { %v1569_v20 = vpop.eup %1089 }
 0x1d9   : > { %v775_v21 = vsel %vm636_vm1, %v1569_v20, 0.0 }
 0x1da   : > { %776 = vadd.xlane.f32.xlu0 %v775_v21 }
 0x1dc   : > { %v1573_v28 = vpop.eup %1091 }
 0x1dd   : > { %v778_v42 = vsel %vm636_vm1, %v1573_v28, 0.0 }
 0x1de   : > { %779 = vadd.xlane.f32.xlu1 %v778_v42 }
 0x22f   : > { %v735_v36 = vpop.xlane.xlu0 %734 }
 0x230   : > { %1093 = vrcp.f32 %v735_v36 }
 0x233   : > { %v738_v43 = vpop.xlane.xlu1 %737 }
 0x234   : > { %1095 = vrcp.f32 %v738_v43 }
 0x237   : > { %v741_v44 = vpop.xlane.xlu0 %740 }
 0x238   : > { %1097 = vrcp.f32 %v741_v44 }
 0x23a   : > { %v1094_v46 = vpop.eup %1093 }
 0x23b   : > { %v797_v47 = vmul.f32 %v1094_v46, %v1501_v37  ;;  %v744_v48 = vpop.xlane.xlu1 %743 }
 0x23c   : > { %1099 = vrcp.f32 %v744_v48 }
 0x23d   : > { %813 = vst.msk [vmem:[%s1581_s23] sm:$0xff] %vm636_vm1, %v797_v47 }
 0x23e   : > { %v1096_v52 = vpop.eup %1095 }
 0x23f   : > { %v798_v51 = vmul.f32 %v1096_v52, %v1506_v41  ;;  %v747_v53 = vpop.xlane.xlu0 %746 }
 0x240   : > { %1101 = vrcp.f32 %v747_v53 }
 0x241   : > { %814 = vst.msk [vmem:[%s1581_s23 + $0x8] sm:$0xff] %vm636_vm1, %v798_v51 }
 0x242   : > { %v1098_v54 = vpop.eup %1097 }
 0x243   : > { %v799_v60 = vmul.f32 %v1098_v54, %v1511_v45  ;;  %v750_v56 = vpop.xlane.xlu1 %749 }
 0x244   : > { %1103 = vrcp.f32 %v750_v56 }
 0x245   : > { %815 = vst.msk [vmem:[%s1581_s23 + $0x10] sm:$0xff] %vm636_vm1, %v799_v60 }
 0x246   : > { %v1100_v37 = vpop.eup %1099 }
 0x247   : > { %v800_v57 = vmul.f32 %v1100_v37, %v1516_v50  ;;  %v753_v59 = vpop.xlane.xlu0 %752 }
 0x248   : > { %1105 = vrcp.f32 %v753_v59 }
 0x249   : > { %816 = vst.msk [vmem:[%s1581_s23 + $0x18] sm:$0xff] %vm636_vm1, %v800_v57 }
 0x24a   : > { %v1102_v41 = vpop.eup %1101 }
 0x24b   : > { %v801_v4 = vmul.f32 %v1102_v41, %v1521_v55  ;;  %v756_v62 = vpop.xlane.xlu1 %755 }
 0x24c   : > { %1107 = vrcp.f32 %v756_v62 }
 0x24d   : > { %817 = vst.msk [vmem:[%s1581_s23 + $0x20] sm:$0xff] %vm636_vm1, %v801_v4 }
 0x24e   : > { %v1104_v45 = vpop.eup %1103 }
 0x24f   : > { %v802_v63 = vmul.f32 %v1104_v45, %v1526_v61  ;;  %v759_v0 = vpop.xlane.xlu0 %758 }
 0x250   : > { %1109 = vrcp.f32 %v759_v0 }
 0x251   : > { %818 = vst.msk [vmem:[%s1581_s23 + $0x28] sm:$0xff] %vm636_vm1, %v802_v63 }
 0x252   : > { %v1106_v50 = vpop.eup %1105 }
 0x253   : > { %v803_v13 = vmul.f32 %v1106_v50, %v1531_v1  ;;  %v762_v2 = vpop.xlane.xlu1 %761 }
 0x254   : > { %1111 = vrcp.f32 %v762_v2 }
 0x255   : > { %819 = vst.msk [vmem:[%s1581_s23 + $0x30] sm:$0xff] %vm636_vm1, %v803_v13 }
 0x256   : > { %v1108_v55 = vpop.eup %1107 }
 0x257   : > { %v804_v6 = vmul.f32 %v1108_v55, %v1536_v8  ;;  %v765_v7 = vpop.xlane.xlu0 %764 }
 0x258   : > { %1113 = vrcp.f32 %v765_v7 }
 0x259   : > { %820 = vst.msk [vmem:[%s1581_s23 + $0x38] sm:$0xff] %vm636_vm1, %v804_v6 }
 0x25a   : > { %v1110_v61 = vpop.eup %1109 }
 0x25b   : > { %v805_v22 = vmul.f32 %v1110_v61, %v1541_v12  ;;  %v768_v9 = vpop.xlane.xlu1 %767 }
 0x25c   : > { %1115 = vrcp.f32 %v768_v9 }
 0x25d   : > { %821 = vst.msk [vmem:[%s1581_s23 + $0x40] sm:$0xff] %vm636_vm1, %v805_v22 }
 0x25e   : > { %v1112_v1 = vpop.eup %1111 }
 0x25f   : > { %v806_v10 = vmul.f32 %v1112_v1, %v1546_v18  ;;  %v771_v11 = vpop.xlane.xlu0 %770 }
 0x260   : > { %1117 = vrcp.f32 %v771_v11 }
 0x261   : > { %822 = vst.msk [vmem:[%s1581_s23 + $0x48] sm:$0xff] %vm636_vm1, %v806_v10 }
 0x262   : > { %v1114_v8 = vpop.eup %1113 }
 0x263   : > { %v807_v31 = vmul.f32 %v1114_v8, %v1551_v25  ;;  %v774_v16 = vpop.xlane.xlu1 %773 }
 0x264   : > { %1119 = vrcp.f32 %v774_v16 }
 0x265   : > { %823 = vst.msk [vmem:[%s1581_s23 + $0x50] sm:$0xff] %vm636_vm1, %v807_v31 }
 0x266   : > { %v1116_v12 = vpop.eup %1115 }
 0x267   : > { %v808_v17 = vmul.f32 %v1116_v12, %v1556_v30  ;;  %v777_v5 = vpop.xlane.xlu0 %776 }
 0x268   : > { %1121 = vrcp.f32 %v777_v5 }
 0x269   : > { %824 = vst.msk [vmem:[%s1581_s23 + $0x58] sm:$0xff] %vm636_vm1, %v808_v17 }
 0x26a   : > { %v1118_v40 = vpop.eup %1117 }
 0x26b   : > { %v809_v18 = vmul.f32 %v1118_v40, %v1561_v34  ;;  %v780_v19 = vpop.xlane.xlu1 %779 }
 0x26c   : > { %1123 = vrcp.f32 %v780_v19 }
 0x26d   : > { %825 = vst.msk [vmem:[%s1581_s23 + $0x60] sm:$0xff] %vm636_vm1, %v809_v18 }
 0x26e   : > { %v1120_v23 = vpop.eup %1119 }
 0x26f   : > { %v810_v24 = vmul.f32 %v1120_v23, %v1565_v15 }
 0x271   : > { %826 = vst.msk [vmem:[%s1581_s23 + $0x68] sm:$0xff] %vm636_vm1, %v810_v24 }
 0x272   : > { %v1122_v49 = vpop.eup %1121 }
 0x273   : > { %v811_v25 = vmul.f32 %v1122_v49, %v1569_v20 }
 0x275   : > { %827 = vst.msk [vmem:[%s1581_s23 + $0x70] sm:$0xff] %vm636_vm1, %v811_v25 }
 0x276   : > { %v1124_v26 = vpop.eup %1123 }
 0x277   : > { %v812_v27 = vmul.f32 %v1124_v26, %v1573_v28 }
 0x279   : > { %828 = vst.msk [vmem:[%s1581_s23 + $0x78] sm:$0xff] %vm636_vm1, %v812_v27 }
 0x27a PF: > { %s13_s12 = sadd.s32 1, %s1131_s12  }
 0x27b   : > { %p10_p4 = scmp.ge.s32.totalorder %s13_s12, 4  }
 0x27d   :  { %12 = sbr.rel (!%p10_p4) target bundleno = 1 (0x1), region = 62 }

</bundles_post_ra>
